<compile_context>
chip_gen: v6e
topology: v6e:2x2x1
jax: 0.10.0
libtpu: 0.0.40
codegen_flags: <defaults>
</compile_context>

<pallas_src>
import math
import functools

import jax
import jax.numpy as jnp
from jax import lax
from jax.experimental import pallas as pl
from jax.experimental.pallas import tpu as pltpu


# Large finite negative used for masking.  Finite (instead of -inf) so that kv tiles
# whose rows are fully masked never poison the online-softmax running statistics with
# NaN; rows masked everywhere produce a finite value instead of PyTorch's NaN.
_MASK_VALUE = -0.7 * float(jnp.finfo(jnp.float32).max)


def _flash_body(q_ref, k_ref, v_ref, mask_ref, o_ref, m_sc, l_sc, acc_sc, scale):
    kv = pl.program_id(2)

    @pl.when(kv == 0)
    def _init():
        m_sc[...] = jnp.full_like(m_sc, -jnp.inf)
        l_sc[...] = jnp.zeros_like(l_sc)
        acc_sc[...] = jnp.zeros_like(acc_sc)

    # Scale q once per block: (bh, tq, D) multiplies instead of (bh, tq, tk).
    q = q_ref[...] * scale              # (bh, tq, D), input dtype preserved
    k = k_ref[...]                      # (bh, tk, D)
    v = v_ref[...]                      # (bh, tk, Dv)

    # scores = q . k^T contracted on head_dim, bh as batch dim; no explicit transpose
    # of k, f32 accumulation on the MXU.
    s = lax.dot_general(
        q, k,
        dimension_numbers=(((2,), (2,)), ((0,), (0,))),
        preferred_element_type=jnp.float32,
    )                                   # (bh, tq, tk)

    if mask_ref is not None:
        # mask block is (tq, tk) (shared) or (bh, tq, tk) (per batch/head);
        # both broadcast against s.
        s = jnp.where(mask_ref[...] != 0, s, _MASK_VALUE)

    # Online-softmax update.
    m_prev = m_sc[...]
    m_new = jnp.maximum(m_prev, jnp.max(s, axis=-1, keepdims=True))
    alpha = jnp.exp(m_prev - m_new)
    p = jnp.exp(s - m_new)

    l_sc[...] = alpha * l_sc[...] + jnp.sum(p, axis=-1, keepdims=True)
    acc_sc[...] = alpha * acc_sc[...] + lax.dot_general(
        p.astype(v.dtype), v,
        dimension_numbers=(((2,), (1,)), ((0,), (0,))),
        preferred_element_type=jnp.float32,
    )
    m_sc[...] = m_new

    @pl.when(kv == pl.num_programs(2) - 1)
    def _finalize():
        # Deferred normalization: one (tq, 1) reciprocal (EUP) + a (tq, Dv) multiply,
        # instead of a (tq, tk) divide on every kv step.
        inv = pl.reciprocal(l_sc[...], approx=True)
        o_ref[...] = (acc_sc[...] * inv).astype(o_ref.dtype)


def _kernel_nomask(q_ref, k_ref, v_ref, o_ref, m_sc, l_sc, acc_sc, *, scale):
    _flash_body(q_ref, k_ref, v_ref, None, o_ref, m_sc, l_sc, acc_sc, scale)


def _kernel_masked(q_ref, k_ref, v_ref, mask_ref, o_ref, m_sc, l_sc, acc_sc, *, scale):
    _flash_body(q_ref, k_ref, v_ref, mask_ref, o_ref, m_sc, l_sc, acc_sc, scale)


def _pick_tile(extent, target, align):
    """Largest `align`-multiple divisor of `extent` that is <= target, or the full
    extent if the axis is small / has no aligned divisor (full dims are always legal)."""
    if extent <= target:
        return extent
    t = (target // align) * align
    while t >= align:
        if extent % t == 0:
            return t
        t -= align
    return extent


def _pick_bh_block(bh, tq, tk, d, budget_bytes=4 * 1024 * 1024):
    """Fold several (batch, head) slices into one grid step when the per-head tiles
    are tiny, so each step has enough work to amortize pipeline overhead."""
    per_bh = 4 * (tq * tk + 2 * tq * d + 4 * tk * d + 2 * tq)
    blk = int(max(1, min(bh, budget_bytes // max(per_bh, 1))))
    while bh % blk:
        blk -= 1
    return blk


def scaled_dot_product_attention(query, key, value, mask=None,
                                 *, tq_target=256, tk_target=512):
    """Pallas equivalent of ScaledDotProductAttention.forward (eval mode)."""
    if query.ndim != 4 or key.ndim != 4 or value.ndim != 4:
        raise ValueError("query, key, and value must be 4-D tensors")
    B, H, Sq, Dq = query.shape
    _, _, Sk, Dk = key.shape
    Dv = value.shape[-1]
    if Dq != Dk:
        raise ValueError("query and key must have same head_dim")

    BH = B * H
    qf = query.reshape(BH, Sq, Dq)
    kf = key.reshape(BH, Sk, Dk)
    vf = value.reshape(BH, Sk, Dv)

    # Tiles: head_dim blocks are always full; tq 8-aligned, tk 128-aligned (lane width)
    # unless the axis is smaller than that, in which case the full extent is used.
    tq = _pick_tile(Sq, tq_target, 8)
    tk = _pick_tile(Sk, tk_target, 128)
    bh_blk = _pick_bh_block(BH, tq, tk, max(Dq, Dv))

    grid = (BH // bh_blk, Sq // tq, Sk // tk)
    scale = 1.0 / math.sqrt(Dq)

    q_spec = pl.BlockSpec((bh_blk, tq, Dq), lambda b, qi, ki: (b, qi, 0))
    k_spec = pl.BlockSpec((bh_blk, tk, Dk), lambda b, qi, ki: (b, ki, 0))
    v_spec = pl.BlockSpec((bh_blk, tk, Dv), lambda b, qi, ki: (b, ki, 0))
    o_spec = pl.BlockSpec((bh_blk, tq, Dv), lambda b, qi, ki: (b, qi, 0))

    in_specs = [q_spec, k_spec, v_spec]
    operands = [qf, kf, vf]

    if mask is None:
        kernel = functools.partial(_kernel_nomask, scale=scale)
    else:
        m4 = jnp.asarray(mask)
        while m4.ndim < 4:
            m4 = m4[None]
        if m4.shape[0] == 1 and m4.shape[1] == 1:
            # Mask shared across batch/heads: single (Sq, Sk) array, index_map ignores
            # the bh grid index -> no B*H x broadcast / HBM mask traffic.
            m_arr = jnp.broadcast_to(m4[0, 0], (Sq, Sk)).astype(jnp.int8)
            m_spec = pl.BlockSpec((tq, tk), lambda b, qi, ki: (qi, ki))
        else:
            m_arr = (jnp.broadcast_to(m4, (B, H, Sq, Sk))
                     .reshape(BH, Sq, Sk).astype(jnp.int8))
            m_spec = pl.BlockSpec((bh_blk, tq, tk), lambda b, qi, ki: (b, qi, ki))
        in_specs.append(m_spec)
        operands.append(m_arr)
        kernel = functools.partial(_kernel_masked, scale=scale)

    out = pl.pallas_call(
        kernel,
        out_shape=jax.ShapeDtypeStruct((BH, Sq, Dv), query.dtype),
        grid=grid,
        in_specs=in_specs,
        out_specs=o_spec,
        scratch_shapes=[
            pltpu.VMEM((bh_blk, tq, 1), jnp.float32),    # running max m
            pltpu.VMEM((bh_blk, tq, 1), jnp.float32),    # running sum l
            pltpu.VMEM((bh_blk, tq, Dv), jnp.float32),   # output accumulator
        ],
        compiler_params=pltpu.CompilerParams(
            dimension_semantics=("parallel", "parallel", "arbitrary"),
            vmem_limit_bytes=32 * 1024 * 1024,
        ),
    )(*operands)

    return out.reshape(B, H, Sq, Dv)


def _reference_sdpa(q, k, v, mask=None):
    d = q.shape[-1]
    s = jnp.einsum("bhqd,bhkd->bhqk", q, k) / math.sqrt(d)
    if mask is not None:
        s = jnp.where(mask, s, -jnp.inf)
    w = jax.nn.softmax(s, axis=-1)
    return jnp.einsum("bhqk,bhkd->bhqd", w, v)


if __name__ == "__main__":
    # Tolerance accounts for the EUP approximate reciprocal used in the final scaling.
    TOL = dict(atol=1e-2, rtol=1e-2)

    # --- small shapes matching the module docstring --------------------------------
    batch, heads, seq, head_dim = 2, 4, 8, 32
    key0 = jax.random.PRNGKey(0)
    kq, kk, kv_ = jax.random.split(key0, 3)
    q = jax.random.normal(kq, (batch, heads, seq, head_dim), dtype=jnp.float32)
    k = jax.random.normal(kk, (batch, heads, seq, head_dim), dtype=jnp.float32)
    v = jax.random.normal(kv_, (batch, heads, seq, head_dim), dtype=jnp.float32)
    causal = jnp.tril(jnp.ones((seq, seq), dtype=jnp.bool_))[None, None, :, :]

    out = jax.block_until_ready(scaled_dot_product_attention(q, k, v, mask=causal))
    ref = _reference_sdpa(q, k, v, mask=causal)
    assert out.shape == (batch, heads, seq, head_dim)
    assert jnp.allclose(out, ref, **TOL), "masked output mismatch vs reference"

    out_nm = jax.block_until_ready(scaled_dot_product_attention(q, k, v))
    assert jnp.allclose(out_nm, _reference_sdpa(q, k, v), **TOL), "no-mask mismatch"

    # --- a shape that exercises the tiled / online-softmax (multi-kv-step) path ----
    B2, H2, S2, D2 = 1, 2, 1024, 64
    kq2, kk2, kv2 = jax.random.split(jax.random.PRNGKey(0), 3)
    q2 = jax.random.normal(kq2, (B2, H2, S2, D2), dtype=jnp.float32)
    k2 = jax.random.normal(kk2, (B2, H2, S2, D2), dtype=jnp.float32)
    v2 = jax.random.normal(kv2, (B2, H2, S2, D2), dtype=jnp.float32)
    causal2 = jnp.tril(jnp.ones((S2, S2), dtype=jnp.bool_))[None, None, :, :]

    out2 = jax.block_until_ready(scaled_dot_product_attention(q2, k2, v2, mask=causal2))
    ref2 = _reference_sdpa(q2, k2, v2, mask=causal2)
    assert jnp.allclose(out2, ref2, **TOL), "tiled online-softmax path mismatch"

    print("KERNEL_OK")
</pallas_src>

<mosaic_0001>
module attributes {stable_mosaic.version = 11 : i64} {
  func.func @_kernel_masked(%arg0: i32, %arg1: i32, %arg2: i32, %arg3: memref<8x8x32xf32, #tpu.memory_space<vmem>>, %arg4: memref<8x8x32xf32, #tpu.memory_space<vmem>>, %arg5: memref<8x8x32xf32, #tpu.memory_space<vmem>>, %arg6: memref<8x8xi8, #tpu.memory_space<vmem>>, %arg7: memref<8x8x32xf32, #tpu.memory_space<vmem>>, %arg8: memref<8x8x1xf32, #tpu.memory_space<vmem>>, %arg9: memref<8x8x1xf32, #tpu.memory_space<vmem>>, %arg10: memref<8x8x32xf32, #tpu.memory_space<vmem>>) attributes {dimension_semantics = [#tpu.dimension_semantics<parallel>, #tpu.dimension_semantics<parallel>, #tpu.dimension_semantics<arbitrary>], iteration_bounds = array<i64: 1, 1, 1>, scalar_prefetch = 0 : i64, scratch_operands = 3 : i64, tpu.core_type = #tpu.core_type<tc>, window_params = [{transform_indices = @transform_0, window_bounds = array<i64: 8, 8, 32>}, {transform_indices = @transform_1, window_bounds = array<i64: 8, 8, 32>}, {transform_indices = @transform_2, window_bounds = array<i64: 8, 8, 32>}, {transform_indices = @transform_3, window_bounds = array<i64: 8, 8>}, {transform_indices = @transform_4, window_bounds = array<i64: 8, 8, 32>}]} {
    %c0_i32 = arith.constant 0 : i32
    %0 = arith.cmpi eq, %arg2, %c0_i32 : i32
    %1 = arith.extui %0 : i1 to i32
    %c0_i32_0 = arith.constant 0 : i32
    %2 = arith.cmpi ne, %1, %c0_i32_0 : i32
    scf.if %2 {
      %cst_36 = arith.constant 0xFF800000 : f32
      %41 = vector.broadcast %cst_36 : f32 to vector<8x8x1xf32>
      %c0_37 = arith.constant 0 : index
      %c0_38 = arith.constant 0 : index
      %c0_39 = arith.constant 0 : index
      %42 = vector.load %arg8[%c0_37, %c0_38, %c0_39] : memref<8x8x1xf32, #tpu.memory_space<vmem>>, vector<8x8x1xf32>
      tpu.vector_store %arg8[%c0_37, %c0_38, %c0_39], %41 {strides = array<i32>} : memref<8x8x1xf32, #tpu.memory_space<vmem>>, vector<8x8x1xf32>,
      %cst_40 = arith.constant 0.000000e+00 : f32
      %43 = vector.broadcast %cst_40 : f32 to vector<8x8x1xf32>
      %c0_41 = arith.constant 0 : index
      %c0_42 = arith.constant 0 : index
      %c0_43 = arith.constant 0 : index
      %44 = vector.load %arg9[%c0_41, %c0_42, %c0_43] : memref<8x8x1xf32, #tpu.memory_space<vmem>>, vector<8x8x1xf32>
      tpu.vector_store %arg9[%c0_41, %c0_42, %c0_43], %43 {strides = array<i32>} : memref<8x8x1xf32, #tpu.memory_space<vmem>>, vector<8x8x1xf32>,
      %cst_44 = arith.constant 0.000000e+00 : f32
      %45 = vector.broadcast %cst_44 : f32 to vector<8x8x32xf32>
      %c0_45 = arith.constant 0 : index
      %c0_46 = arith.constant 0 : index
      %c0_47 = arith.constant 0 : index
      %46 = vector.load %arg10[%c0_45, %c0_46, %c0_47] : memref<8x8x32xf32, #tpu.memory_space<vmem>>, vector<8x8x32xf32>
      tpu.vector_store %arg10[%c0_45, %c0_46, %c0_47], %45 {strides = array<i32>} : memref<8x8x32xf32, #tpu.memory_space<vmem>>, vector<8x8x32xf32>,
    } else {
    }
    %c0 = arith.constant 0 : index
    %c0_1 = arith.constant 0 : index
    %c0_2 = arith.constant 0 : index
    %3 = vector.load %arg3[%c0, %c0_1, %c0_2] : memref<8x8x32xf32, #tpu.memory_space<vmem>>, vector<8x8x32xf32>
    %cst = arith.constant 0.176776692 : f32
    %4 = vector.broadcast %cst : f32 to vector<8x8x32xf32>
    %5 = arith.mulf %3, %4 : vector<8x8x32xf32>
    %c0_3 = arith.constant 0 : index
    %c0_4 = arith.constant 0 : index
    %c0_5 = arith.constant 0 : index
    %6 = vector.load %arg4[%c0_3, %c0_4, %c0_5] : memref<8x8x32xf32, #tpu.memory_space<vmem>>, vector<8x8x32xf32>
    %c0_6 = arith.constant 0 : index
    %c0_7 = arith.constant 0 : index
    %c0_8 = arith.constant 0 : index
    %7 = vector.load %arg5[%c0_6, %c0_7, %c0_8] : memref<8x8x32xf32, #tpu.memory_space<vmem>>, vector<8x8x32xf32>
    %cst_9 = arith.constant dense<0.000000e+00> : vector<8x8x8xf32>
    %8 = tpu.matmul %5, %6, %cst_9 {dimension_numbers = #tpu.dot_dimension_numbers<[2], [2], [1], [1], [0, 0, 0, 1, 1, 1], [0], [0]>} : vector<8x8x32xf32>, vector<8x8x32xf32>, vector<8x8x8xf32> -> vector<8x8x8xf32>
    %c0_10 = arith.constant 0 : index
    %c0_11 = arith.constant 0 : index
    %9 = vector.load %arg6[%c0_10, %c0_11] : memref<8x8xi8, #tpu.memory_space<vmem>>, vector<8x8xi8>
    %c0_i8 = arith.constant 0 : i8
    %10 = vector.broadcast %c0_i8 : i8 to vector<8x8xi8>
    %11 = arith.cmpi ne, %9, %10 : vector<8x8xi8>
    %cst_12 = arith.constant -2.38197633E+38 : f32
    %12 = vector.shape_cast %11 : vector<8x8xi1> to vector<1x8x8xi1>
    %13 = vector.broadcast %12 : vector<1x8x8xi1> to vector<8x8x8xi1>
    %14 = vector.broadcast %cst_12 : f32 to vector<8x8x8xf32>
    %15 = arith.select %13, %8, %14 : vector<8x8x8xi1>, vector<8x8x8xf32>
    %c0_13 = arith.constant 0 : index
    %c0_14 = arith.constant 0 : index
    %c0_15 = arith.constant 0 : index
    %16 = vector.load %arg8[%c0_13, %c0_14, %c0_15] : memref<8x8x1xf32, #tpu.memory_space<vmem>>, vector<8x8x1xf32>
    %cst_16 = arith.constant dense<0xFF800000> : vector<8x8xf32>
    %17 = vector.multi_reduction <maximumf>, %15, %cst_16 [2] : vector<8x8x8xf32> to vector<8x8xf32>
    %18 = vector.shape_cast %17 : vector<8x8xf32> to vector<8x8x1xf32>
    %19 = arith.maximumf %16, %18 : vector<8x8x1xf32>
    %20 = arith.subf %16, %19 : vector<8x8x1xf32>
    %21 = math.exp %20 : vector<8x8x1xf32>
    %22 = vector.broadcast %19 : vector<8x8x1xf32> to vector<8x8x8xf32>
    %23 = arith.subf %15, %22 : vector<8x8x8xf32>
    %24 = math.exp %23 : vector<8x8x8xf32>
    %c0_17 = arith.constant 0 : index
    %c0_18 = arith.constant 0 : index
    %c0_19 = arith.constant 0 : index
    %25 = vector.load %arg9[%c0_17, %c0_18, %c0_19] : memref<8x8x1xf32, #tpu.memory_space<vmem>>, vector<8x8x1xf32>
    %26 = arith.mulf %21, %25 : vector<8x8x1xf32>
    %cst_20 = arith.constant dense<0.000000e+00> : vector<8x8xf32>
    %27 = vector.multi_reduction <add>, %24, %cst_20 [2] : vector<8x8x8xf32> to vector<8x8xf32>
    %28 = vector.shape_cast %27 : vector<8x8xf32> to vector<8x8x1xf32>
    %29 = arith.addf %26, %28 : vector<8x8x1xf32>
    %c0_21 = arith.constant 0 : index
    %c0_22 = arith.constant 0 : index
    %c0_23 = arith.constant 0 : index
    %30 = vector.load %arg9[%c0_21, %c0_22, %c0_23] : memref<8x8x1xf32, #tpu.memory_space<vmem>>, vector<8x8x1xf32>
    tpu.vector_store %arg9[%c0_21, %c0_22, %c0_23], %29 {strides = array<i32>} : memref<8x8x1xf32, #tpu.memory_space<vmem>>, vector<8x8x1xf32>,
    %c0_24 = arith.constant 0 : index
    %c0_25 = arith.constant 0 : index
    %c0_26 = arith.constant 0 : index
    %31 = vector.load %arg10[%c0_24, %c0_25, %c0_26] : memref<8x8x32xf32, #tpu.memory_space<vmem>>, vector<8x8x32xf32>
    %32 = vector.broadcast %21 : vector<8x8x1xf32> to vector<8x8x32xf32>
    %33 = arith.mulf %32, %31 : vector<8x8x32xf32>
    %cst_27 = arith.constant dense<0.000000e+00> : vector<8x8x32xf32>
    %34 = tpu.matmul %24, %7, %cst_27 {dimension_numbers = #tpu.dot_dimension_numbers<[2], [1], [1], [2], [0, 0, 0, 1, 1, 2], [0], [0]>} : vector<8x8x8xf32>, vector<8x8x32xf32>, vector<8x8x32xf32> -> vector<8x8x32xf32>
    %35 = arith.addf %33, %34 : vector<8x8x32xf32>
    %c0_28 = arith.constant 0 : index
    %c0_29 = arith.constant 0 : index
    %c0_30 = arith.constant 0 : index
    %36 = vector.load %arg10[%c0_28, %c0_29, %c0_30] : memref<8x8x32xf32, #tpu.memory_space<vmem>>, vector<8x8x32xf32>
    tpu.vector_store %arg10[%c0_28, %c0_29, %c0_30], %35 {strides = array<i32>} : memref<8x8x32xf32, #tpu.memory_space<vmem>>, vector<8x8x32xf32>,
    %c0_31 = arith.constant 0 : index
    %c0_32 = arith.constant 0 : index
    %c0_33 = arith.constant 0 : index
    %37 = vector.load %arg8[%c0_31, %c0_32, %c0_33] : memref<8x8x1xf32, #tpu.memory_space<vmem>>, vector<8x8x1xf32>
    tpu.vector_store %arg8[%c0_31, %c0_32, %c0_33], %19 {strides = array<i32>} : memref<8x8x1xf32, #tpu.memory_space<vmem>>, vector<8x8x1xf32>,
    %c0_i32_34 = arith.constant 0 : i32
    %38 = arith.cmpi eq, %arg2, %c0_i32_34 : i32
    %39 = arith.extui %38 : i1 to i32
    %c0_i32_35 = arith.constant 0 : i32
    %40 = arith.cmpi ne, %39, %c0_i32_35 : i32
    scf.if %40 {
      %c0_36 = arith.constant 0 : index
      %c0_37 = arith.constant 0 : index
      %c0_38 = arith.constant 0 : index
      %41 = vector.load %arg9[%c0_36, %c0_37, %c0_38] : memref<8x8x1xf32, #tpu.memory_space<vmem>>, vector<8x8x1xf32>
      %42 = tpu.reciprocal %41 {approx = true} : vector<8x8x1xf32> -> vector<8x8x1xf32>
      %c0_39 = arith.constant 0 : index
      %c0_40 = arith.constant 0 : index
      %c0_41 = arith.constant 0 : index
      %43 = vector.load %arg10[%c0_39, %c0_40, %c0_41] : memref<8x8x32xf32, #tpu.memory_space<vmem>>, vector<8x8x32xf32>
      %44 = vector.broadcast %42 : vector<8x8x1xf32> to vector<8x8x32xf32>
      %45 = arith.mulf %43, %44 : vector<8x8x32xf32>
      %c0_42 = arith.constant 0 : index
      %c0_43 = arith.constant 0 : index
      %c0_44 = arith.constant 0 : index
      %46 = vector.load %arg7[%c0_42, %c0_43, %c0_44] : memref<8x8x32xf32, #tpu.memory_space<vmem>>, vector<8x8x32xf32>
      tpu.vector_store %arg7[%c0_42, %c0_43, %c0_44], %45 {strides = array<i32>} : memref<8x8x32xf32, #tpu.memory_space<vmem>>, vector<8x8x32xf32>,
    } else {
    }
    return
  }
  func.func @transform_0(%arg0: i32, %arg1: i32, %arg2: i32) -> (i32, i32, i32) {
    %c0_i32 = arith.constant 0 : i32
    %c0_i32_0 = arith.constant 0 : i32
    return %arg0, %arg1, %c0_i32 : i32, i32, i32
  }
  func.func @transform_1(%arg0: i32, %arg1: i32, %arg2: i32) -> (i32, i32, i32) {
    %c0_i32 = arith.constant 0 : i32
    %c0_i32_0 = arith.constant 0 : i32
    return %arg0, %arg2, %c0_i32 : i32, i32, i32
  }
  func.func @transform_2(%arg0: i32, %arg1: i32, %arg2: i32) -> (i32, i32, i32) {
    %c0_i32 = arith.constant 0 : i32
    %c0_i32_0 = arith.constant 0 : i32
    return %arg0, %arg2, %c0_i32 : i32, i32, i32
  }
  func.func @transform_3(%arg0: i32, %arg1: i32, %arg2: i32) -> (i32, i32) {
    %c0_i32 = arith.constant 0 : i32
    return %arg1, %arg2 : i32, i32
  }
  func.func @transform_4(%arg0: i32, %arg1: i32, %arg2: i32) -> (i32, i32, i32) {
    %c0_i32 = arith.constant 0 : i32
    %c0_i32_0 = arith.constant 0 : i32
    return %arg0, %arg1, %c0_i32 : i32, i32, i32
  }
}

</mosaic_0001>

<bundles_post_ra>
// kernel: tpu_custom_call.1
= control target key start
LH: loop header
LB: loop body
LE: loop exit
PB: predicated region body
PF: predicated region fallthrough
CT: control target
= control target key end

     0   :  { %9 = vsyncpa [#allocation6], 0  ;;  %s2350_s0 = inlined_call_operand.hbm [shape: f32[8,8,32], index: 0, kind: input, shape index: {}]   ;;  %s2351_s1 = inlined_call_operand.hbm [shape: f32[8,8,32], index: 1, kind: input, shape index: {}]   ;;  %s2352_s2 = inlined_call_operand.hbm [shape: f32[8,8,32], index: 2, kind: input, shape index: {}]   ;;  %s2353_s3 = inlined_call_operand.vmem [shape: s8[8,8], index: 3, kind: input, shape index: {}]   ;;  %s2354_s4 = inlined_call_operand.hbm [shape: f32[8,8,32], index: 4, kind: output, shape index: {}]  }
   0x1   :  { %10 = vsyncpa [#allocation9], 0 }
   0x2   :  { %11 = vsyncpa [#allocation7], 0  ;;  %s1980_s15 = smov [#allocation8]   ;;  %s1981_s17 = smov [#allocation5]  }
   0x3   :  { %s29_s16 = sshll.u32 %s1980_s15, 4  ;;  %s17_s18 = sshll.u32 %s1981_s17, 4  ;;  %s30_s16 = int_to_ptr.vmem [resolvable:$true] %s29_s16  ;;  %s18_s18 = int_to_ptr.vmem [resolvable:$true] %s17_s18 }
   0x4   :  { %s1902_s19 = scalar_lea.vmem %s30_s16, 1024  ;;  %p1907_p1 = scmp.lt.s32.totalorder %s30_s16, %s30_s16 }
   0x5   :  { %p1903_p0 = scmp.ne.s32.totalorder %s30_s16, %s1902_s19  ;;  %p1908_p2 = scmp.lt.s32.totalorder %s1902_s19, %s1902_s19 }
   0x7   :  { %p1909_p3 = por %p1908_p2, %p1907_p1 }
   0x9   :  { %p1910_p4 = pnand %p1909_p3, %p1903_p0 }
   0xb   :  { %1913 = shalt.err (!%p1910_p4)
}
   0xc   :  { %s1982_s20 = smov 128   ;;  %s1983_s21 = smov 8  }
   0xd   :  { %35 = dma.hbm_to_vmem [thread:$0]  %s2351_s1, 1024, %s30_s16, [#allocation9], %s1982_s20, %s1982_s20, %s1983_s21  }
   0xe   :  { %s1922_s24 = scalar_lea.vmem %s18_s18, 1024  ;;  %p1927_p6 = scmp.lt.s32.totalorder %s18_s18, %s18_s18 }
   0xf   :  { %p1923_p5 = scmp.ne.s32.totalorder %s18_s18, %s1922_s24  ;;  %p1928_p7 = scmp.lt.s32.totalorder %s1922_s24, %s1922_s24 }
  0x11   :  { %p1929_p8 = por %p1928_p7, %p1927_p6 }
  0x13   :  { %p1930_p9 = pnand %p1929_p8, %p1923_p5 }
  0x15   :  { %1933 = shalt.err (!%p1930_p9)
}
  0x16   :  { %23 = dma.hbm_to_vmem [thread:$0]  %s2350_s0, 1024, %s18_s18, [#allocation6], %s1982_s20, %s1982_s20, %s1983_s21  }
  0x17   :  { %s1984_s27 = smov [#allocation10]  }
  0x18   :  { %s41_s28 = sshll.u32 %s1984_s27, 4  ;;  %s42_s28 = int_to_ptr.vmem [resolvable:$true] %s41_s28 }
  0x19   :  { %s1942_s29 = scalar_lea.vmem %s42_s28, 1024  ;;  %p1947_p11 = scmp.lt.s32.totalorder %s42_s28, %s42_s28 }
  0x1a   :  { %p1943_p10 = scmp.ne.s32.totalorder %s42_s28, %s1942_s29  ;;  %p1948_p12 = scmp.lt.s32.totalorder %s1942_s29, %s1942_s29 }
  0x1c   :  { %p1949_p13 = por %p1948_p12, %p1947_p11 }
  0x1e   :  { %p1950_p0 = pnand %p1949_p13, %p1943_p10 }
  0x20   :  { %1953 = shalt.err (!%p1950_p0)
}
  0x21   :  { %47 = dma.hbm_to_vmem [thread:$0]  %s2352_s2, 1024, %s42_s28, [#allocation9], %s1982_s20, %s1982_s20, %s1983_s21  }
  0x22   :  { %1974 = dma.done.wait [#allocation6], 1024  }
  0x23   :  { %1975 = vsyncadd [#allocation6], 4294966272 }
  0x24   :  { %1976 = dma.done.wait [#allocation9], 2048  }
  0x25   :  { %1977 = vsyncadd [#allocation9], 4294965248  ;;  %vm82_vm0 = vcmask 261120   ;;  %v1985_v0 = vmov 0.0   ;;  %vm1986_vm1 = vmmov 0   ;;  %v107_v1 = vld [vmem:[#allocation8] sm:$0xff] }
  0x26   :  { %1754 = vmatprep.subr.mxu0 %v1985_v0  ;;  %83 = vst.msk [vmem:[#allocation4] sm:$0xff] %vm82_vm0, %v1985_v0  ;;  %84 = vst.msk [vmem:[#allocation4 + $0x8] sm:$0xff] %vm82_vm0, %v1985_v0  ;;  %1759 = vmatprep.subr.mxu1 %v1985_v0  ;;  %v108_v2 = vld [vmem:[#allocation8 + $0x8] sm:$0xff]  ;;  %v91_v3 = vld [vmem:[#allocation5] sm:$0xff]  ;;  %v1987_v25 = vmov 0   ;;  %vm65_vm2 = vcmask 7168  }
  0x27   :  { %85 = vst.msk [vmem:[#allocation4 + $0x10] sm:$0xff] %vm82_vm0, %v1985_v0  ;;  %86 = vst.msk [vmem:[#allocation4 + $0x18] sm:$0xff] %vm82_vm0, %v1985_v0  ;;  %1756 = vmatprep.mubr.msk.f32.mxu0 %vm1986_vm1, %v1985_v0  ;;  %1761 = vmatprep.mubr.msk.f32.mxu1 %vm1986_vm1, %v1985_v0  ;;  %v99_v4 = vmul.f32 0.17677669, %v91_v3  ;;  %v92_v5 = vld [vmem:[#allocation5 + $0x8] sm:$0xff]  ;;  %v93_v6 = vld [vmem:[#allocation5 + $0x10] sm:$0xff] }
  0x28   :  { %87 = vst.msk [vmem:[#allocation4 + $0x20] sm:$0xff] %vm82_vm0, %v1985_v0  ;;  %88 = vst.msk [vmem:[#allocation4 + $0x28] sm:$0xff] %vm82_vm0, %v1985_v0  ;;  %1755 = vmatpush3.xpose.msk.msra.mxu0 %vm82_vm0, %v107_v1  ;;  %1760 = vmatpush3.xpose.msk.msra.mxu1 %vm82_vm0, %v108_v2  ;;  %v100_v7 = vmul.f32 0.17677669, %v92_v5  ;;  %v109_v8 = vld [vmem:[#allocation8 + $0x10] sm:$0xff]  ;;  %v94_v9 = vld [vmem:[#allocation5 + $0x18] sm:$0xff] }
  0x29   :  { %89 = vst.msk [vmem:[#allocation4 + $0x30] sm:$0xff] %vm82_vm0, %v1985_v0  ;;  %90 = vst.msk [vmem:[#allocation4 + $0x38] sm:$0xff] %vm82_vm0, %v1985_v0  ;;  %1764 = vmatprep.subr.mxu0 %v1985_v0  ;;  %1769 = vmatprep.subr.mxu1 %v1985_v0  ;;  %v110_v10 = vld [vmem:[#allocation8 + $0x18] sm:$0xff]  ;;  %v101_v11 = vmul.f32 0.17677669, %v93_v6  ;;  %v95_v13 = vld [vmem:[#allocation5 + $0x20] sm:$0xff] }
  0x2a   :  { %v102_v12 = vmul.f32 0.17677669, %v94_v9  ;;  %v111_v14 = vld [vmem:[#allocation8 + $0x20] sm:$0xff]  ;;  %v96_v15 = vld [vmem:[#allocation5 + $0x28] sm:$0xff]  ;;  %v103_v17 = vmul.f32 0.17677669, %v95_v13  ;;  %1844 = vset.pattern.permute.xlu0 %v1987_v25  ;;  %1845 = vset.pattern.permute.xlu1 %v1987_v25 }
  0x2b   :  { %1757 = vmatmul.mubr.msk.f32.vlgmr.msra.gmra.mxu0 %vm82_vm0, %v99_v4  ;;  %1762 = vmatmul.mubr.msk.f32.vlgmr.msra.gmra.mxu1 %vm82_vm0, %v100_v7  ;;  %v112_v16 = vld [vmem:[#allocation8 + $0x28] sm:$0xff]  ;;  %v104_v18 = vmul.f32 0.17677669, %v96_v15  ;;  %v97_v19 = vld [vmem:[#allocation5 + $0x30] sm:$0xff]  ;;  %v98_v21 = vld [vmem:[#allocation5 + $0x38] sm:$0xff]  ;;  %v1988_v26 = vmov -inf  }
  0x2c   :  { %1765 = vmatpush3.xpose.msk.msra.mxu0 %vm82_vm0, %v109_v8  ;;  %1766 = vmatprep.mubr.msk.f32.mxu0 %vm1986_vm1, %v1985_v0  ;;  %v113_v20 = vld [vmem:[#allocation8 + $0x30] sm:$0xff]  ;;  %v114_v22 = vld [vmem:[#allocation8 + $0x38] sm:$0xff]  ;;  %v105_v23 = vmul.f32 0.17677669, %v97_v19  ;;  %v106_v24 = vmul.f32 0.17677669, %v98_v21 }
  0x2d   :  { %1770 = vmatpush3.xpose.msk.msra.mxu1 %vm82_vm0, %v110_v10  ;;  %1771 = vmatprep.mubr.msk.f32.mxu1 %vm1986_vm1, %v1985_v0  ;;  %66 = vst.msk [vmem:[#allocation2] sm:$0xff] %vm65_vm2, %v1988_v26  ;;  %67 = vst.msk [vmem:[#allocation2 + $0x8] sm:$0xff] %vm65_vm2, %v1988_v26  ;;  %v732_v27 = vld [vmem:[%s2353_s3] sm:$0x3]  ;;  %vm755_vm5 = vcmask 64512   ;;  %s1989_s3 = smov [#allocation11]  }
  0x2e   :  { %1774 = vmatprep.subr.mxu0 %v1985_v0  ;;  %1779 = vmatprep.subr.mxu1 %v1985_v0  ;;  %68 = vst.msk [vmem:[#allocation2 + $0x10] sm:$0xff] %vm65_vm2, %v1988_v26  ;;  %69 = vst.msk [vmem:[#allocation2 + $0x18] sm:$0xff] %vm65_vm2, %v1988_v26  ;;  %vm733_vm3 = vnez %v732_v27  ;;  %s1685_s5 = sshll.u32 %s1989_s3, 4  ;;  %s1686_s5 = int_to_ptr.vmem [resolvable:$true] %s1685_s5 }
  0x2f   :  { %1767 = vmatmul.mubr.msk.f32.vlgmr.msra.gmra.mxu0 %vm82_vm0, %v101_v11  ;;  %70 = vst.msk [vmem:[#allocation2 + $0x20] sm:$0xff] %vm65_vm2, %v1988_v26  ;;  %71 = vst.msk [vmem:[#allocation2 + $0x28] sm:$0xff] %vm65_vm2, %v1988_v26  ;;  %v734_v28 = vsel %vm733_vm3, 16843009, %v1987_v25  ;;  %s1954_s6 = scalar_lea.vmem %s1686_s5, 1024  ;;  %p1959_p2 = scmp.lt.s32.totalorder %s1686_s5, %s1686_s5 }
  0x30   :  { %1772 = vmatmul.mubr.msk.f32.vlgmr.msra.gmra.mxu1 %vm82_vm0, %v102_v12  ;;  %1775 = vmatpush3.xpose.msk.msra.mxu0 %vm82_vm0, %v111_v14  ;;  %72 = vst.msk [vmem:[#allocation2 + $0x30] sm:$0xff] %vm65_vm2, %v1988_v26  ;;  %73 = vst.msk [vmem:[#allocation2 + $0x38] sm:$0xff] %vm65_vm2, %v1988_v26  ;;  %v735_v29 = vunpack.c.0.s8 %v734_v28  ;;  %p1955_p1 = scmp.ne.s32.totalorder %s1686_s5, %s1954_s6  ;;  %p1960_p3 = scmp.lt.s32.totalorder %s1954_s6, %s1954_s6 }
  0x31   :  { %1776 = vmatprep.mubr.msk.f32.mxu0 %vm1986_vm1, %v1985_v0  ;;  %1780 = vmatpush3.xpose.msk.msra.mxu1 %vm82_vm0, %v112_v16  ;;  %74 = vst.msk [vmem:[#allocation3] sm:$0xff] %vm65_vm2, %v1985_v0  ;;  %75 = vst.msk [vmem:[#allocation3 + $0x8] sm:$0xff] %vm65_vm2, %v1985_v0 }
  0x32   :  { %1781 = vmatprep.mubr.msk.f32.mxu1 %vm1986_vm1, %v1985_v0  ;;  %1784 = vmatprep.subr.mxu0 %v1985_v0  ;;  %76 = vst.msk [vmem:[#allocation3 + $0x10] sm:$0xff] %vm65_vm2, %v1985_v0  ;;  %77 = vst.msk [vmem:[#allocation3 + $0x18] sm:$0xff] %vm65_vm2, %v1985_v0  ;;  %vm2122_vm4 = vcmp.ne.s32.totalorder %v735_v29, 0  ;;  %v115_v29 = vld [vmem:[#allocation10] sm:$0xff]  ;;  %p1961_p4 = por %p1960_p3, %p1959_p2 }
  0x33   :  { %1777 = vmatmul.mubr.msk.f32.vlgmr.msra.gmra.mxu0 %vm82_vm0, %v103_v17  ;;  %1789 = vmatprep.subr.mxu1 %v1985_v0  ;;  %78 = vst.msk [vmem:[#allocation3 + $0x20] sm:$0xff] %vm65_vm2, %v1985_v0  ;;  %79 = vst.msk [vmem:[#allocation3 + $0x28] sm:$0xff] %vm65_vm2, %v1985_v0 }
  0x34   :  { %1782 = vmatmul.mubr.msk.f32.vlgmr.msra.gmra.mxu1 %vm82_vm0, %v104_v18  ;;  %1785 = vmatpush3.xpose.msk.msra.mxu0 %vm82_vm0, %v113_v20  ;;  %80 = vst.msk [vmem:[#allocation3 + $0x30] sm:$0xff] %vm65_vm2, %v1985_v0  ;;  %81 = vst.msk [vmem:[#allocation3 + $0x38] sm:$0xff] %vm65_vm2, %v1985_v0  ;;  %v2174_v63 = vld [vmem:[#allocation2] sm:$0xff]  ;;  %v2179_v3 = vld [vmem:[#allocation2 + $0x8] sm:$0xff]  ;;  %p1962_p5 = pnand %p1961_p4, %p1955_p1 }
  0x35   :  { %1786 = vmatprep.mubr.msk.f32.mxu0 %vm1986_vm1, %v1985_v0  ;;  %1790 = vmatpush3.xpose.msk.msra.mxu1 %vm82_vm0, %v114_v22  ;;  %v2181_v4 = vld [vmem:[#allocation2 + $0x10] sm:$0xff]  ;;  %v2194_v10 = vld [vmem:[#allocation2 + $0x18] sm:$0xff] }
  0x36   :  { %1791 = vmatprep.mubr.msk.f32.mxu1 %vm1986_vm1, %v1985_v0  ;;  %1794 = vmatprep.subr.mxu0 %v1985_v0  ;;  %v2196_v11 = vld [vmem:[#allocation2 + $0x20] sm:$0xff]  ;;  %v2213_v18 = vld [vmem:[#allocation2 + $0x28] sm:$0xff] }
  0x37   :  { %1787 = vmatmul.mubr.msk.f32.vlgmr.msra.gmra.mxu0 %vm82_vm0, %v105_v23  ;;  %1799 = vmatprep.subr.mxu1 %v1985_v0  ;;  %v2215_v19 = vld [vmem:[#allocation2 + $0x30] sm:$0xff]  ;;  %v2232_v26 = vld [vmem:[#allocation2 + $0x38] sm:$0xff] }
  0x38   :  { %1792 = vmatmul.mubr.msk.f32.vlgmr.msra.gmra.mxu1 %vm82_vm0, %v106_v24  ;;  %1796 = vmatprep.mubr.msk.f32.mxu0 %vm1986_vm1, %v1985_v0 }
  0x39   :  { %1801 = vmatprep.mubr.msk.f32.mxu1 %vm1986_vm1, %v1985_v0  ;;  %1795 = vmatpush3.msra.mxu0 %v115_v29 }
  0x3a   :  { %1804 = vmatprep.subr.mxu0 %v1985_v0 }
  0xeb   :  { %v196_v31 = vpop.f32.mrf.mxu0  ;;  %v272_v32 = vpop.f32.mrf.mxu1 }
  0xec   :  { %v2128_v33 = vsel %vm2122_vm4, %v196_v31, -2.3819763e+38  ;;  %v2132_v34 = vsel %vm2122_vm4, %v272_v32, -2.3819763e+38 }
  0xed   :  { %v1758_v35 = vpop.f32.mrf.mxu0  ;;  %v756_v36 = vsel %vm755_vm5, %v2128_v33, -inf  ;;  %v1763_v37 = vpop.f32.mrf.mxu1  ;;  %v759_v39 = vsel %vm755_vm5, %v2132_v34, -inf }
  0xee   :  { %757 = vmax.xlane.f32.xlu0 %v756_v36  ;;  %v116_v35 = vld [vmem:[#allocation10 + $0x8] sm:$0xff] }
  0xef   :  { %v348_v38 = vpop.f32.mrf.mxu0  ;;  %1800 = vmatpush3.msra.mxu1 %v116_v35 }
  0xf0   :  { %v2140_v40 = vsel %vm2122_vm4, %v348_v38, -2.3819763e+38  ;;  %v424_v41 = vpop.f32.mrf.mxu1  ;;  %1809 = vmatprep.subr.mxu1 %v1985_v0 }
  0xf1   :  { %v1768_v42 = vpop.f32.mrf.mxu0  ;;  %v2144_v43 = vsel %vm2122_vm4, %v424_v41, -2.3819763e+38  ;;  %v762_v44 = vsel %vm755_vm5, %v2140_v40, -inf }
  0xf2   :  { %760 = vmax.xlane.f32.xlu0 %v759_v39  ;;  %763 = vmax.xlane.f32.xlu1 %v762_v44  ;;  %v1773_v45 = vpop.f32.mrf.mxu1  ;;  %v765_v47 = vsel %vm755_vm5, %v2144_v43, -inf }
  0xf3   :  { %v500_v46 = vpop.f32.mrf.mxu0 }
  0xf4   :  { %v2152_v48 = vsel %vm2122_vm4, %v500_v46, -2.3819763e+38  ;;  %v576_v49 = vpop.f32.mrf.mxu1 }
  0xf5   :  { %v1778_v50 = vpop.f32.mrf.mxu0  ;;  %v2156_v51 = vsel %vm2122_vm4, %v576_v49, -2.3819763e+38  ;;  %v768_v52 = vsel %vm755_vm5, %v2152_v48, -inf }
  0xf6   :  { %766 = vmax.xlane.f32.xlu1 %v765_v47  ;;  %769 = vmax.xlane.f32.xlu0 %v768_v52  ;;  %v1783_v53 = vpop.f32.mrf.mxu1  ;;  %v771_v55 = vsel %vm755_vm5, %v2156_v51, -inf }
  0xf7   :  { %v652_v54 = vpop.f32.mrf.mxu0  ;;  %v117_v53 = vld [vmem:[#allocation10 + $0x10] sm:$0xff] }
  0xf8   :  { %v2164_v56 = vsel %vm2122_vm4, %v652_v54, -2.3819763e+38  ;;  %v728_v57 = vpop.f32.mrf.mxu1 }
  0xf9   :  { %v1788_v58 = vpop.f32.mrf.mxu0  ;;  %v2168_v59 = vsel %vm2122_vm4, %v728_v57, -2.3819763e+38  ;;  %v774_v60 = vsel %vm755_vm5, %v2164_v56, -inf }
  0xfa   :  { %772 = vmax.xlane.f32.xlu1 %v771_v55  ;;  %775 = vmax.xlane.f32.xlu0 %v774_v60  ;;  %v1793_v61 = vpop.f32.mrf.mxu1  ;;  %v777_v62 = vsel %vm755_vm5, %v2168_v59, -inf }
  0xfe   :  { %778 = vmax.xlane.f32.xlu1 %v777_v62 }
 0x177   :  { %v758_v1 = vpop.xlane.xlu0 %757 }
 0x178   :  { %v2177_v2 = vmax.f32 %v2174_v63, %v758_v1 }
 0x17a   :  { %v788_v5 = vsub.f32 %v2174_v63, %v2177_v2  ;;  %1589 = vst.msk [vmem:[#allocation2] sm:$0xff] %vm65_vm2, %v2177_v2  ;;  %814 = vperm.xlu0 %1844, %v2177_v2  }
 0x17b   :  { %v761_v6 = vpop.xlane.xlu0 %760  ;;  %v764_v7 = vpop.xlane.xlu1 %763 }
 0x17c   :  { %v2189_v8 = vmax.f32 %v2179_v3, %v761_v6  ;;  %v2192_v9 = vmax.f32 %v2181_v4, %v764_v7 }
 0x17e   :  { %v789_v12 = vsub.f32 %v2179_v3, %v2189_v8  ;;  %1590 = vst.msk [vmem:[#allocation2 + $0x8] sm:$0xff] %vm65_vm2, %v2189_v8  ;;  %819 = vperm.xlu1 %1845, %v2189_v8   ;;  %v790_v13 = vsub.f32 %v2181_v4, %v2192_v9  ;;  %1591 = vst.msk [vmem:[#allocation2 + $0x10] sm:$0xff] %vm65_vm2, %v2192_v9 }
 0x17f   :  { %v767_v14 = vpop.xlane.xlu1 %766  ;;  %v770_v15 = vpop.xlane.xlu0 %769 }
 0x180   :  { %v2208_v16 = vmax.f32 %v2194_v10, %v767_v14  ;;  %v2211_v17 = vmax.f32 %v2196_v11, %v770_v15 }
 0x182   :  { %824 = vperm.xlu1 %1845, %v2192_v9   ;;  %v791_v20 = vsub.f32 %v2194_v10, %v2208_v16  ;;  %1592 = vst.msk [vmem:[#allocation2 + $0x18] sm:$0xff] %vm65_vm2, %v2208_v16  ;;  %v792_v21 = vsub.f32 %v2196_v11, %v2211_v17  ;;  %1593 = vst.msk [vmem:[#allocation2 + $0x20] sm:$0xff] %vm65_vm2, %v2211_v17 }
 0x183   :  { %v773_v22 = vpop.xlane.xlu1 %772  ;;  %v776_v23 = vpop.xlane.xlu0 %775 }
 0x184   :  { %v2227_v24 = vmax.f32 %v2213_v18, %v773_v22  ;;  %v2230_v25 = vmax.f32 %v2215_v19, %v776_v23  ;;  %v802_v3 = vmul.f32 1.442695, %v791_v20  ;;  %v804_v8 = vmul.f32 1.442695, %v792_v21  ;;  %v877_v21 = vld [vmem:[#allocation3 + $0x8] sm:$0xff] }
 0x186   :  { %829 = vperm.xlu1 %1845, %v2208_v16   ;;  %v793_v27 = vsub.f32 %v2213_v18, %v2227_v24  ;;  %1594 = vst.msk [vmem:[#allocation2 + $0x28] sm:$0xff] %vm65_vm2, %v2227_v24  ;;  %v794_v28 = vsub.f32 %v2215_v19, %v2230_v25  ;;  %1595 = vst.msk [vmem:[#allocation2 + $0x30] sm:$0xff] %vm65_vm2, %v2230_v25  ;;  %v876_v18 = vld [vmem:[#allocation3] sm:$0xff] }
 0x187   :  { %v779_v30 = vpop.xlane.xlu1 %778 }
 0x188   :  { %v2244_v31 = vmax.f32 %v2232_v26, %v779_v30  ;;  %v121_v30 = vld [vmem:[#allocation10 + $0x30] sm:$0xff]  ;;  %v806_v63 = vmul.f32 1.442695, %v793_v27  ;;  %v808_v2 = vmul.f32 1.442695, %v794_v28 }
 0x189   :  { %v878_v27 = vld [vmem:[#allocation3 + $0x10] sm:$0xff] }
 0x18a   :  { %834 = vperm.xlu1 %1845, %v2211_v17   ;;  %v795_v32 = vsub.f32 %v2232_v26, %v2244_v31  ;;  %1596 = vst.msk [vmem:[#allocation2 + $0x38] sm:$0xff] %vm65_vm2, %v2244_v31 }
 0x18c   :  { %v810_v4 = vmul.f32 1.442695, %v795_v32 }
 0x18e   :  { %839 = vperm.xlu1 %1845, %v2227_v24  }
 0x192   :  { %844 = vperm.xlu1 %1845, %v2230_v25  }
 0x196   :  { %849 = vperm.xlu1 %1845, %v2244_v31  }
 0x1f5   :  { %v815_v36 = vpop.permute.xlu0 %814 }
 0x1f6   :  { %v852_v37 = vsub.f32 %v2128_v33, %v815_v36  ;;  %v122_v36 = vld [vmem:[#allocation10 + $0x38] sm:$0xff] }
 0x1f8   :  { %v860_v38 = vmul.f32 1.442695, %v852_v37 }
 0x1f9   :  { %v820_v39 = vpop.permute.xlu1 %819 }
 0x1fa   :  { %1846 = vpow2.f32 %v860_v38  ;;  %v853_v41 = vsub.f32 %v2132_v34, %v820_v39 }
 0x1fc   :  { %v862_v42 = vmul.f32 1.442695, %v853_v41 }
 0x1fd   :  { %v825_v44 = vpop.permute.xlu1 %824 }
 0x1fe   :  { %1848 = vpow2.f32 %v862_v42  ;;  %v854_v45 = vsub.f32 %v2140_v40, %v825_v44  ;;  %v798_v44 = vmul.f32 1.442695, %v789_v12 }
 0x200   :  { %v864_v46 = vmul.f32 1.442695, %v854_v45 }
 0x201   :  { %v830_v47 = vpop.permute.xlu1 %829 }
 0x202   :  { %1850 = vpow2.f32 %v864_v46  ;;  %v855_v49 = vsub.f32 %v2144_v43, %v830_v47  ;;  %v118_v43 = vld [vmem:[#allocation10 + $0x18] sm:$0xff]  ;;  %v796_v46 = vmul.f32 1.442695, %v788_v5 }
 0x203   :  { %v879_v47 = vld [vmem:[#allocation3 + $0x18] sm:$0xff] }
 0x204   :  { %v866_v50 = vmul.f32 1.442695, %v855_v49 }
 0x205   :  { %v835_v52 = vpop.permute.xlu1 %834 }
 0x206   :  { %1852 = vpow2.f32 %v866_v50  ;;  %v856_v33 = vsub.f32 %v2152_v48, %v835_v52 }
 0x207   :  { %v1847_v54 = vpop.eup %1846 }
 0x208   :  { %v868_v55 = vmul.f32 1.442695, %v856_v33  ;;  %1797 = vmatmul.mubr.msk.f32.vlgmr.msra.gmra.mxu0 %vm755_vm5, %v1847_v54  ;;  %v892_v34 = vsel %vm755_vm5, %v1847_v54, 0.0 }
 0x209   :  { %v840_v57 = vpop.permute.xlu1 %839  ;;  %893 = vadd.xlane.f32.xlu1 %v892_v34  ;;  %1805 = vmatpush3.msra.mxu0 %v117_v53  ;;  %v880_v53 = vld [vmem:[#allocation3 + $0x20] sm:$0xff] }
 0x20a   :  { %1854 = vpow2.f32 %v868_v55  ;;  %v857_v40 = vsub.f32 %v2156_v51, %v840_v57  ;;  %1806 = vmatprep.mubr.msk.f32.mxu0 %vm1986_vm1, %v1985_v0  ;;  %1814 = vmatprep.subr.mxu0 %v1985_v0  ;;  %v119_v51 = vld [vmem:[#allocation10 + $0x20] sm:$0xff] }
 0x20b   :  { %v1849_v48 = vpop.eup %1848 }
 0x20c   :  { %v870_v58 = vmul.f32 1.442695, %v857_v40  ;;  %1802 = vmatmul.mubr.msk.f32.vlgmr.msra.gmra.mxu1 %vm755_vm5, %v1849_v48  ;;  %v895_v60 = vsel %vm755_vm5, %v1849_v48, 0.0  ;;  %v881_v40 = vld [vmem:[#allocation3 + $0x28] sm:$0xff] }
 0x20d   :  { %v845_v61 = vpop.permute.xlu1 %844  ;;  %896 = vadd.xlane.f32.xlu0 %v895_v60  ;;  %1810 = vmatpush3.msra.mxu1 %v118_v43 }
 0x20e   :  { %1856 = vpow2.f32 %v870_v58  ;;  %v858_v62 = vsub.f32 %v2164_v56, %v845_v61  ;;  %1811 = vmatprep.mubr.msk.f32.mxu1 %vm1986_vm1, %v1985_v0  ;;  %1819 = vmatprep.subr.mxu1 %v1985_v0  ;;  %v120_v56 = vld [vmem:[#allocation10 + $0x28] sm:$0xff]  ;;  %v882_v61 = vld [vmem:[#allocation3 + $0x30] sm:$0xff] }
 0x20f   :  { %v1851_v1 = vpop.eup %1850 }
 0x210   :  { %v872_v6 = vmul.f32 1.442695, %v858_v62  ;;  %1807 = vmatmul.mubr.msk.f32.vlgmr.msra.gmra.mxu0 %vm755_vm5, %v1851_v1  ;;  %v898_v7 = vsel %vm755_vm5, %v1851_v1, 0.0 }
 0x211   :  { %v850_v14 = vpop.permute.xlu1 %849  ;;  %899 = vadd.xlane.f32.xlu0 %v898_v7  ;;  %1815 = vmatpush3.msra.mxu0 %v119_v51 }
 0x212   :  { %1858 = vpow2.f32 %v872_v6  ;;  %v859_v15 = vsub.f32 %v2168_v59, %v850_v14  ;;  %1816 = vmatprep.mubr.msk.f32.mxu0 %vm1986_vm1, %v1985_v0  ;;  %1824 = vmatprep.subr.mxu0 %v1985_v0  ;;  %v883_v14 = vld [vmem:[#allocation3 + $0x38] sm:$0xff] }
 0x213   :  { %v1853_v22 = vpop.eup %1852 }
 0x214   :  { %v874_v23 = vmul.f32 1.442695, %v859_v15  ;;  %1812 = vmatmul.mubr.msk.f32.vlgmr.msra.gmra.mxu1 %vm755_vm5, %v1853_v22  ;;  %v901_v29 = vsel %vm755_vm5, %v1853_v22, 0.0 }
 0x215   :  { %902 = vadd.xlane.f32.xlu1 %v901_v29  ;;  %1820 = vmatpush3.msra.mxu1 %v120_v56 }
 0x216   :  { %1860 = vpow2.f32 %v874_v23  ;;  %1821 = vmatprep.mubr.msk.f32.mxu1 %vm1986_vm1, %v1985_v0  ;;  %1829 = vmatprep.subr.mxu1 %v1985_v0 }
 0x217   :  { %v1855_v59 = vpop.eup %1854  ;;  %1862 = vpow2.f32 %v798_v44  ;;  %v933_v44 = vld [vmem:[#allocation4] sm:$0xff] }
 0x218   :  { %1817 = vmatmul.mubr.msk.f32.vlgmr.msra.gmra.mxu0 %vm755_vm5, %v1855_v59  ;;  %v904_v35 = vsel %vm755_vm5, %v1855_v59, 0.0  ;;  %1864 = vpow2.f32 %v796_v46 }
 0x219   :  { %905 = vadd.xlane.f32.xlu0 %v904_v35  ;;  %1825 = vmatpush3.msra.mxu0 %v121_v30 }
 0x21a   :  { %1826 = vmatprep.mubr.msk.f32.mxu0 %vm1986_vm1, %v1985_v0 }
 0x21b   :  { %v1857_v37 = vpop.eup %1856 }
 0x21c   :  { %1822 = vmatmul.mubr.msk.f32.vlgmr.msra.gmra.mxu1 %vm755_vm5, %v1857_v37  ;;  %v907_v38 = vsel %vm755_vm5, %v1857_v37, 0.0 }
 0x21d   :  { %908 = vadd.xlane.f32.xlu1 %v907_v38  ;;  %1830 = vmatpush3.msra.mxu1 %v122_v36 }
 0x21e   :  { %1831 = vmatprep.mubr.msk.f32.mxu1 %vm1986_vm1, %v1985_v0  ;;  %v800_v0 = vmul.f32 1.442695, %v790_v13 }
 0x21f   :  { %v1859_v39 = vpop.eup %1858 }
 0x220   :  { %1827 = vmatmul.mubr.msk.f32.vlgmr.msra.gmra.mxu0 %vm755_vm5, %v1859_v39  ;;  %v910_v41 = vsel %vm755_vm5, %v1859_v39, 0.0  ;;  %1866 = vpow2.f32 %v800_v0 }
 0x221   :  { %911 = vadd.xlane.f32.xlu0 %v910_v41  ;;  %1868 = vpow2.f32 %v802_v3 }
 0x222   :  { %1870 = vpow2.f32 %v804_v8  ;;  %v934_v8 = vld [vmem:[#allocation4 + $0x8] sm:$0xff] }
 0x223   :  { %v1861_v42 = vpop.eup %1860  ;;  %1872 = vpow2.f32 %v806_v63 }
 0x224   :  { %1832 = vmatmul.mubr.msk.f32.vlgmr.msra.gmra.mxu1 %vm755_vm5, %v1861_v42  ;;  %v913_v45 = vsel %vm755_vm5, %v1861_v42, 0.0  ;;  %1874 = vpow2.f32 %v808_v2  ;;  %v1863_v5 = vpop.eup %1862 }
 0x225   :  { %914 = vadd.xlane.f32.xlu1 %v913_v45  ;;  %1876 = vpow2.f32 %v810_v4  ;;  %v1865_v9 = vpop.eup %1864  ;;  %v885_v25 = vmul.f32 %v1863_v5, %v877_v21 }
 0x226   :  { %v884_v19 = vmul.f32 %v1865_v9, %v876_v18 }
 0x22d   :  { %v1867_v10 = vpop.eup %1866 }
 0x22e   :  { %v1869_v11 = vpop.eup %1868  ;;  %v886_v31 = vmul.f32 %v1867_v10, %v878_v27 }
 0x22f   :  { %v1871_v12 = vpop.eup %1870  ;;  %v887_v52 = vmul.f32 %v1869_v11, %v879_v47  ;;  %v938_v47 = vld [vmem:[#allocation4 + $0x28] sm:$0xff] }
 0x230   :  { %v1873_v13 = vpop.eup %1872  ;;  %v888_v34 = vmul.f32 %v1871_v12, %v880_v53 }
 0x231   :  { %v1875_v16 = vpop.eup %1874  ;;  %v889_v58 = vmul.f32 %v1873_v13, %v881_v40 }
 0x232   :  { %v1877_v17 = vpop.eup %1876  ;;  %v890_v1 = vmul.f32 %v1875_v16, %v882_v61 }
 0x233   :  { %v891_v22 = vmul.f32 %v1877_v17, %v883_v14 }
 0x236   :  { %948 = vperm.xlu1 %1845, %v1863_v5  }
 0x237   :  { %943 = vperm.xlu0 %1844, %v1865_v9   ;;  %v935_v9 = vld [vmem:[#allocation4 + $0x10] sm:$0xff] }
 0x23a   :  { %953 = vperm.xlu1 %1845, %v1867_v10  }
 0x23b   :  { %958 = vperm.xlu0 %1844, %v1869_v11  }
 0x23e   :  { %963 = vperm.xlu1 %1845, %v1871_v12  }
 0x23f   :  { %968 = vperm.xlu0 %1844, %v1873_v13  }
 0x242   :  { %973 = vperm.xlu1 %1845, %v1875_v16  }
 0x243   :  { %978 = vperm.xlu0 %1844, %v1877_v17   ;;  %v936_v17 = vld [vmem:[#allocation4 + $0x18] sm:$0xff] }
 0x292   :  { %v894_v20 = vpop.xlane.xlu1 %893 }
 0x293   :  { %v916_v24 = vadd.f32 %v894_v20, %v884_v19 }
 0x295   :  { %925 = vst.msk [vmem:[#allocation3] sm:$0xff] %vm65_vm2, %v916_v24 }
 0x296   :  { %v897_v26 = vpop.xlane.xlu0 %896 }
 0x297   :  { %v917_v28 = vadd.f32 %v897_v26, %v885_v25  ;;  %v937_v25 = vld [vmem:[#allocation4 + $0x20] sm:$0xff] }
 0x299   :  { %926 = vst.msk [vmem:[#allocation3 + $0x8] sm:$0xff] %vm65_vm2, %v917_v28 }
 0x29a   :  { %v900_v32 = vpop.xlane.xlu0 %899 }
 0x29b   :  { %v918_v49 = vadd.f32 %v900_v32, %v886_v31 }
 0x29c   :  { %v1600_v50 = vld [vmem:[#allocation3] sm:$0xff] }
 0x29d   :  { %927 = vst.msk [vmem:[#allocation3 + $0x10] sm:$0xff] %vm65_vm2, %v918_v49  ;;  %1878 = vrcp.f32 %v1600_v50 }
 0x29e   :  { %v903_v33 = vpop.xlane.xlu1 %902 }
 0x29f   :  { %v919_v54 = vadd.f32 %v903_v33, %v887_v52 }
 0x2a0   :  { %v1601_v55 = vld [vmem:[#allocation3 + $0x8] sm:$0xff] }
 0x2a1   :  { %928 = vst.msk [vmem:[#allocation3 + $0x18] sm:$0xff] %vm65_vm2, %v919_v54  ;;  %1880 = vrcp.f32 %v1601_v55  ;;  %v939_v54 = vld [vmem:[#allocation4 + $0x30] sm:$0xff] }
 0x2a2   :  { %v906_v57 = vpop.xlane.xlu0 %905 }
 0x2a3   :  { %v920_v43 = vadd.f32 %v906_v57, %v888_v34 }
 0x2a4   :  { %v1602_v48 = vld [vmem:[#allocation3 + $0x10] sm:$0xff] }
 0x2a5   :  { %929 = vst.msk [vmem:[#allocation3 + $0x20] sm:$0xff] %vm65_vm2, %v920_v43  ;;  %1882 = vrcp.f32 %v1602_v48  ;;  %v940_v48 = vld [vmem:[#allocation4 + $0x38] sm:$0xff] }
 0x2a6   :  { %v909_v60 = vpop.xlane.xlu1 %908 }
 0x2a7   :  { %v921_v62 = vadd.f32 %v909_v60, %v889_v58 }
 0x2a8   :  { %v1603_v51 = vld [vmem:[#allocation3 + $0x18] sm:$0xff] }
 0x2a9   :  { %930 = vst.msk [vmem:[#allocation3 + $0x28] sm:$0xff] %vm65_vm2, %v921_v62  ;;  %1884 = vrcp.f32 %v1603_v51 }
 0x2aa   :  { %v1879_v6 = vpop.eup %1878  ;;  %v912_v7 = vpop.xlane.xlu0 %911 }
 0x2ab   :  { %v922_v15 = vadd.f32 %v912_v7, %v890_v1  ;;  %1626 = vperm.xlu1 %1845, %v1879_v6  }
 0x2ac   :  { %v1604_v56 = vld [vmem:[#allocation3 + $0x20] sm:$0xff] }
 0x2ad   :  { %931 = vst.msk [vmem:[#allocation3 + $0x30] sm:$0xff] %vm65_vm2, %v922_v15  ;;  %1886 = vrcp.f32 %v1604_v56 }
 0x2ae   :  { %v1881_v23 = vpop.eup %1880  ;;  %v915_v29 = vpop.xlane.xlu1 %914 }
 0x2af   :  { %v923_v30 = vadd.f32 %v915_v29, %v891_v22  ;;  %1631 = vperm.xlu0 %1844, %v1881_v23  }
 0x2b0   :  { %v1605_v59 = vld [vmem:[#allocation3 + $0x28] sm:$0xff] }
 0x2b1   :  { %932 = vst.msk [vmem:[#allocation3 + $0x38] sm:$0xff] %vm65_vm2, %v923_v30  ;;  %1888 = vrcp.f32 %v1605_v59 }
 0x2b2   :  { %v1883_v35 = vpop.eup %1882  ;;  %v944_v45 = vpop.permute.xlu0 %943 }
 0x2b3   :  { %1636 = vperm.xlu1 %1845, %v1883_v35   ;;  %v949_v0 = vpop.permute.xlu1 %948  ;;  %v981_v3 = vmul.f32 %v944_v45, %v933_v44 }
 0x2b4   :  { %v1606_v36 = vld [vmem:[#allocation3 + $0x30] sm:$0xff]  ;;  %v982_v5 = vmul.f32 %v949_v0, %v934_v8 }
 0x2b5   :  { %1890 = vrcp.f32 %v1606_v36 }
 0x2b6   :  { %v1885_v37 = vpop.eup %1884  ;;  %v959_v18 = vpop.permute.xlu0 %958 }
 0x2b7   :  { %1641 = vperm.xlu0 %1844, %v1885_v37   ;;  %v954_v10 = vpop.permute.xlu1 %953  ;;  %v984_v24 = vmul.f32 %v959_v18, %v936_v17 }
 0x2b8   :  { %v1607_v38 = vld [vmem:[#allocation3 + $0x38] sm:$0xff]  ;;  %v983_v16 = vmul.f32 %v954_v10, %v935_v9 }
 0x2b9   :  { %1892 = vrcp.f32 %v1607_v38 }
 0x2ba   :  { %v1887_v39 = vpop.eup %1886  ;;  %v969_v49 = vpop.permute.xlu0 %968 }
 0x2bb   :  { %1646 = vperm.xlu1 %1845, %v1887_v39   ;;  %v964_v26 = vpop.permute.xlu1 %963  ;;  %v986_v53 = vmul.f32 %v969_v49, %v938_v47 }
 0x2bc   :  { %v985_v32 = vmul.f32 %v964_v26, %v937_v25 }
 0x2be   :  { %v1889_v41 = vpop.eup %1888  ;;  %v979_v58 = vpop.permute.xlu0 %978 }
 0x2bf   :  { %1651 = vperm.xlu0 %1844, %v1889_v41   ;;  %v974_v55 = vpop.permute.xlu1 %973  ;;  %v988_v51 = vmul.f32 %v979_v58, %v940_v48 }
 0x2c0   :  { %v987_v43 = vmul.f32 %v974_v55, %v939_v54 }
 0x2c2   :  { %v1891_v42 = vpop.eup %1890 }
 0x2c3   :  { %1656 = vperm.xlu1 %1845, %v1891_v42  }
 0x2c6   :  { %v1893_v46 = vpop.eup %1892 }
 0x2c7   :  { %1661 = vperm.xlu0 %1844, %v1893_v46  }
 0x2c8   :  { %v1058_v63 = vpop.f32.mrf.mxu0 }
 0x2c9   :  { %v1573_v2 = vadd.f32 %v1058_v63, %v981_v3 }
 0x2ca   :  { %v1798_v4 = vpop.f32.mrf.mxu0 }
 0x2cb   :  { %1581 = vst.msk [vmem:[#allocation4] sm:$0xff] %vm82_vm0, %v1573_v2 }
 0x2cc   :  { %v1131_v11 = vpop.f32.mrf.mxu1 }
 0x2cd   :  { %v1574_v12 = vadd.f32 %v1131_v11, %v982_v5 }
 0x2ce   :  { %v1803_v13 = vpop.f32.mrf.mxu1 }
 0x2cf   :  { %1582 = vst.msk [vmem:[#allocation4 + $0x8] sm:$0xff] %vm82_vm0, %v1574_v12 }
 0x2d0   :  { %v1204_v19 = vpop.f32.mrf.mxu0 }
 0x2d1   :  { %v1575_v20 = vadd.f32 %v1204_v19, %v983_v16 }
 0x2d2   :  { %v1808_v21 = vpop.f32.mrf.mxu0  ;;  %v1616_v14 = vld [vmem:[#allocation4] sm:$0xff] }
 0x2d3   :  { %1583 = vst.msk [vmem:[#allocation4 + $0x10] sm:$0xff] %vm82_vm0, %v1575_v20 }
 0x2d4   :  { %v1277_v27 = vpop.f32.mrf.mxu1 }
 0x2d5   :  { %v1576_v28 = vadd.f32 %v1277_v27, %v984_v24 }
 0x2d6   :  { %v1813_v31 = vpop.f32.mrf.mxu1  ;;  %v1617_v22 = vld [vmem:[#allocation4 + $0x8] sm:$0xff] }
 0x2d7   :  { %1584 = vst.msk [vmem:[#allocation4 + $0x18] sm:$0xff] %vm82_vm0, %v1576_v28 }
 0x2d8   :  { %v1350_v50 = vpop.f32.mrf.mxu0 }
 0x2d9   :  { %v1577_v52 = vadd.f32 %v1350_v50, %v985_v32 }
 0x2da   :  { %v1818_v33 = vpop.f32.mrf.mxu0  ;;  %v1618_v30 = vld [vmem:[#allocation4 + $0x10] sm:$0xff] }
 0x2db   :  { %1585 = vst.msk [vmem:[#allocation4 + $0x20] sm:$0xff] %vm82_vm0, %v1577_v52 }
 0x2dc   :  { %v1423_v34 = vpop.f32.mrf.mxu1 }
 0x2dd   :  { %v1578_v57 = vadd.f32 %v1423_v34, %v986_v53 }
 0x2de   :  { %v1823_v40 = vpop.f32.mrf.mxu1  ;;  %v1619_v36 = vld [vmem:[#allocation4 + $0x18] sm:$0xff] }
 0x2df   :  { %1586 = vst.msk [vmem:[#allocation4 + $0x28] sm:$0xff] %vm82_vm0, %v1578_v57 }
 0x2e0   :  { %v1496_v60 = vpop.f32.mrf.mxu0 }
 0x2e1   :  { %v1579_v61 = vadd.f32 %v1496_v60, %v987_v43 }
 0x2e2   :  { %v1828_v62 = vpop.f32.mrf.mxu0  ;;  %v1620_v39 = vld [vmem:[#allocation4 + $0x20] sm:$0xff] }
 0x2e3   :  { %1587 = vst.msk [vmem:[#allocation4 + $0x30] sm:$0xff] %vm82_vm0, %v1579_v61 }
 0x2e4   :  { %v1569_v1 = vpop.f32.mrf.mxu1 }
 0x2e5   :  { %v1580_v6 = vadd.f32 %v1569_v1, %v988_v51 }
 0x2e6   :  { %v1833_v7 = vpop.f32.mrf.mxu1  ;;  %v1621_v44 = vld [vmem:[#allocation4 + $0x28] sm:$0xff] }
 0x2e7   :  { %1588 = vst.msk [vmem:[#allocation4 + $0x38] sm:$0xff] %vm82_vm0, %v1580_v6 }
 0x2ea   :  { %v1622_v0 = vld [vmem:[#allocation4 + $0x30] sm:$0xff] }
 0x2ee   :  { %v1623_v63 = vld [vmem:[#allocation4 + $0x38] sm:$0xff] }
 0x326   :  { %v1627_v15 = vpop.permute.xlu1 %1626 }
 0x327   :  { %v1664_v56 = vmul.f32 %v1627_v15, %v1616_v14 }
 0x329   :  { %1672 = vst.msk [vmem:[#allocation11] sm:$0xff] %vm82_vm0, %v1664_v56 }
 0x32a   :  { %v1632_v23 = vpop.permute.xlu0 %1631 }
 0x32b   :  { %v1665_v29 = vmul.f32 %v1632_v23, %v1617_v22 }
 0x32d   :  { %1673 = vst.msk [vmem:[#allocation11 + $0x8] sm:$0xff] %vm82_vm0, %v1665_v29 }
 0x32e   :  { %v1637_v59 = vpop.permute.xlu1 %1636 }
 0x32f   :  { %v1666_v35 = vmul.f32 %v1637_v59, %v1618_v30 }
 0x331   :  { %1674 = vst.msk [vmem:[#allocation11 + $0x10] sm:$0xff] %vm82_vm0, %v1666_v35 }
 0x332   :  { %v1642_v37 = vpop.permute.xlu0 %1641 }
 0x333   :  { %v1667_v38 = vmul.f32 %v1642_v37, %v1619_v36 }
 0x335   :  { %1675 = vst.msk [vmem:[#allocation11 + $0x18] sm:$0xff] %vm82_vm0, %v1667_v38 }
 0x336   :  { %v1647_v41 = vpop.permute.xlu1 %1646 }
 0x337   :  { %v1668_v42 = vmul.f32 %v1647_v41, %v1620_v39 }
 0x339   :  { %1676 = vst.msk [vmem:[#allocation11 + $0x20] sm:$0xff] %vm82_vm0, %v1668_v42 }
 0x33a   :  { %v1652_v45 = vpop.permute.xlu0 %1651 }
 0x33b   :  { %v1669_v46 = vmul.f32 %v1652_v45, %v1621_v44 }
 0x33d   :  { %1677 = vst.msk [vmem:[#allocation11 + $0x28] sm:$0xff] %vm82_vm0, %v1669_v46 }
 0x33e   :  { %v1657_v3 = vpop.permute.xlu1 %1656 }
 0x33f   :  { %v1670_v8 = vmul.f32 %v1657_v3, %v1622_v0 }
 0x341   :  { %1678 = vst.msk [vmem:[#allocation11 + $0x30] sm:$0xff] %vm82_vm0, %v1670_v8 }
 0x342   :  { %v1662_v2 = vpop.permute.xlu0 %1661 }
 0x343   :  { %v1671_v4 = vmul.f32 %v1662_v2, %v1623_v63 }
 0x345   :  { %1679 = vst.msk [vmem:[#allocation11 + $0x38] sm:$0xff] %vm82_vm0, %v1671_v4 }
 0x346   :  { %1965 = shalt.err (!%p1962_p5)
}
 0x347   :  { %1691 = dma.vmem_to_hbm [thread:$0]  %s1686_s5, 1024, %s2354_s4, [#allocation7], %s1982_s20, %s1982_s20, %s1983_s21  }
 0x348   :  { %1978 = dma.done.wait [#allocation7], 1024  }
 0x349   :  { %1979 = vsyncadd [#allocation7], 4294966272 }
 0x34a   :  { %1695 = vsyncpa [#allocation6], 1 }
 0x34b   :  { %1696 = vsyncpa [#allocation9], 1 }
 0x34c   :  { %1697 = vsyncpa [#allocation7], 1 }

</bundles_post_ra>
